<compile_context>
chip_gen: v7x
topology: tpu7x:2x2x1
jax: 0.10.0
libtpu: 0.0.40
codegen_flags: <defaults>
</compile_context>

<pallas_src>
import jax
import jax.numpy as jnp
from jax import lax
from jax.experimental import pallas as pl
from jax.experimental.pallas import tpu as pltpu
import numpy as np


# ---------------------------------------------------------------------------
# Fused kernel: (folded) spatial-embedding + LSTM + real_classifier MLP
# ---------------------------------------------------------------------------
def _disc_kernel(x_ref, whh_ref, w1_ref, pk_ref, scores_ref, h_ref, gx_ref):
    T, B, _ = x_ref.shape
    H = whh_ref.shape[0]
    H4 = whh_ref.shape[1]
    M = w1_ref.shape[1]
    eps = 1e-5

    # ---- unpack the small parameters from the single packed block -----------
    b_fold = pk_ref[0:1, 0:H4]        # folded bias (g-quadrant pre-scaled by 2)
    b1 = pk_ref[1:2, 0:M]
    g1 = pk_ref[2:3, 0:M]
    be1 = pk_ref[3:4, 0:M]
    w2r = pk_ref[4:5, 0:M]
    b2 = pk_ref[5:6, 0:1]
    g2 = pk_ref[6:7, 0:1]
    be2 = pk_ref[7:8, 0:1]
    wf0 = pk_ref[8:9, 0:H4]           # folded input weights, rows of (2, 4H)
    wf1 = pk_ref[9:10, 0:H4]

    # ---- loop-invariant input projection for ALL timesteps -------------------
    # K=2 contraction done as two VPU broadcast FMAs (no wasted MXU pass),
    # result staged in VMEM scratch so it is not held live across the loop.
    x = x_ref[...]                                              # (T, B, 2)
    gx_ref[...] = x[:, :, 0:1] * wf0 + x[:, :, 1:2] * wf1 + b_fold  # (T, B, 4H)

    whh = whh_ref[...]                                          # (H, 4H) bf16

    # Lane mask selecting the g-gate quadrant (gate order along 4H lanes: i,f,g,o).
    lane = lax.broadcasted_iota(jnp.int32, (B, H4), 1)
    g_mask = jnp.logical_and(lane >= 2 * H, lane < 3 * H)

    h0 = jnp.zeros((B, H), jnp.float32)
    c0 = jnp.zeros((B, H), jnp.float32)

    unroll = 4 if T % 4 == 0 else (2 if T % 2 == 0 else 1)

    def chunk(i, carry):
        h, c = carry
        base = i * unroll
        for k in range(unroll):       # manual partial unroll (bounded live ranges)
            gates = gx_ref[base + k] + jnp.dot(
                h.astype(jnp.bfloat16), whh,
                preferred_element_type=jnp.float32)             # (B, 4H) f32 acc
            # single full-vreg EUP push; tanh(x) = 2*sigmoid(2x) - 1 with the
            # g-quadrant already pre-scaled by 2 in the weights/bias.
            sig = jax.nn.sigmoid(gates)
            act = jnp.where(g_mask, 2.0 * sig - 1.0, sig)
            i_g = act[:, 0 * H:1 * H]
            f_g = act[:, 1 * H:2 * H]
            g_g = act[:, 2 * H:3 * H]
            o_g = act[:, 3 * H:4 * H]
            c = f_g * c + i_g * g_g
            h = o_g * jnp.tanh(c)
        return h, c

    h, _ = lax.fori_loop(0, T // unroll, chunk, (h0, c0))
    h_ref[...] = h                                              # final hidden (B, H)

    # ---- real_classifier: Linear -> BN(train) -> ReLU -> Linear -> BN -> ReLU
    y = jnp.dot(h, w1_ref[...], preferred_element_type=jnp.float32) + b1
    mu = jnp.mean(y, axis=0, keepdims=True)
    var = jnp.mean((y - mu) * (y - mu), axis=0, keepdims=True)  # biased (train-mode BN)
    y = (y - mu) * lax.rsqrt(var + eps) * g1 + be1
    y = jnp.maximum(y, 0.0)

    # (B, M) @ (M, 1) as VPU multiply + lane reduce instead of a 1-column MXU push.
    z = jnp.sum(y * w2r, axis=1, keepdims=True) + b2
    mu2 = jnp.mean(z, axis=0, keepdims=True)
    var2 = jnp.mean((z - mu2) * (z - mu2), axis=0, keepdims=True)
    z = (z - mu2) * lax.rsqrt(var2 + eps) * g2 + be2
    scores_ref[...] = jnp.maximum(z, 0.0)


# ---------------------------------------------------------------------------
# One-time parameter preparation (hoisted out of the per-call forward path)
# ---------------------------------------------------------------------------
def prepare_params(p):
    H = p["w_hh"].shape[0]
    H4 = 4 * H
    M = p["w1"].shape[1]

    # Fold the spatial embedding into the LSTM input projection:
    #   e @ w_ih = (x @ w_emb + b_emb) @ w_ih = x @ (w_emb @ w_ih) + (b_emb @ w_ih)
    w_fold = p["w_emb"] @ p["w_ih"]                         # (2, 4H)
    b_fold = p["b_emb"] @ p["w_ih"] + p["b_lstm"]           # (1, 4H)

    # tanh(x) = 2*sigmoid(2x) - 1: pre-scale the g-gate quadrant by 2 so the
    # kernel only needs one sigmoid per step.
    gate_scale = jnp.ones((1, H4), jnp.float32).at[:, 2 * H:3 * H].set(2.0)
    w_fold = w_fold * gate_scale
    b_fold = b_fold * gate_scale
    whh_bf16 = (p["w_hh"] * gate_scale).astype(jnp.bfloat16)  # bf16 MXU operand

    # Pack every small vector/scalar parameter (and the 2-row folded input
    # weights) into one (16, W) f32 block -> a single DMA instead of ~10.
    W = max(H4, M)
    packed = jnp.zeros((16, W), jnp.float32)
    packed = packed.at[0, :H4].set(b_fold[0])
    packed = packed.at[1, :M].set(p["b1"][0])
    packed = packed.at[2, :M].set(p["g1"][0])
    packed = packed.at[3, :M].set(p["be1"][0])
    packed = packed.at[4, :M].set(p["w2"][:, 0])
    packed = packed.at[5, 0].set(p["b2"][0, 0])
    packed = packed.at[6, 0].set(p["g2"][0, 0])
    packed = packed.at[7, 0].set(p["be2"][0, 0])
    packed = packed.at[8, :H4].set(w_fold[0])
    packed = packed.at[9, :H4].set(w_fold[1])

    return {"whh_bf16": whh_bf16, "w1": p["w1"], "packed": packed}


# ---------------------------------------------------------------------------
# Python wrapper: TrajectoryDiscriminator.forward (d_type='local')
# ---------------------------------------------------------------------------
def trajectory_discriminator_forward(traj, traj_rel, kparams, seq_start_end=None):
    # d_type='local': traj / seq_start_end are unused (no PoolHiddenNet).
    del traj, seq_start_end
    T, B, _ = traj_rel.shape
    H = kparams["whh_bf16"].shape[0]

    vmem = pl.BlockSpec(memory_space=pltpu.MemorySpace.VMEM)
    scores, final_h = pl.pallas_call(
        _disc_kernel,
        out_shape=(jax.ShapeDtypeStruct((B, 1), jnp.float32),
                   jax.ShapeDtypeStruct((B, H), jnp.float32)),
        in_specs=[vmem, vmem, vmem, vmem],
        out_specs=(vmem, vmem),
        scratch_shapes=[pltpu.VMEM((T, B, 4 * H), jnp.float32)],  # staged gates_x
    )(traj_rel, kparams["whh_bf16"], kparams["w1"], kparams["packed"])
    return scores, final_h


# ---------------------------------------------------------------------------
# Pure-JAX reference for correctness checking (uses the UN-folded f32 params)
# ---------------------------------------------------------------------------
def reference_forward(traj_rel, p):
    T, B, _ = traj_rel.shape
    H = p["w_hh"].shape[0]
    e = traj_rel.reshape(-1, 2) @ p["w_emb"] + p["b_emb"]
    e = e.reshape(T, B, -1)
    h = jnp.zeros((B, H), jnp.float32)
    c = jnp.zeros((B, H), jnp.float32)
    for t in range(T):
        gates = e[t] @ p["w_ih"] + h @ p["w_hh"] + p["b_lstm"]
        i_g = jax.nn.sigmoid(gates[:, 0 * H:1 * H])
        f_g = jax.nn.sigmoid(gates[:, 1 * H:2 * H])
        g_g = jnp.tanh(gates[:, 2 * H:3 * H])
        o_g = jax.nn.sigmoid(gates[:, 3 * H:4 * H])
        c = f_g * c + i_g * g_g
        h = o_g * jnp.tanh(c)

    def bn(x, g, b):
        mu = jnp.mean(x, axis=0, keepdims=True)
        var = jnp.mean((x - mu) ** 2, axis=0, keepdims=True)
        return (x - mu) / jnp.sqrt(var + 1e-5) * g + b

    y = jnp.maximum(bn(h @ p["w1"] + p["b1"], p["g1"], p["be1"]), 0.0)
    z = jnp.maximum(bn(y @ p["w2"] + p["b2"], p["g2"], p["be2"]), 0.0)
    return z, h


# ---------------------------------------------------------------------------
# Deterministic parameter construction (synthetic weights)
# ---------------------------------------------------------------------------
def make_params(key, embedding_dim, h_dim, mlp_dim):
    ks = jax.random.split(key, 10)
    s = 0.1
    return {
        # spatial_embedding: Linear(2, E)
        "w_emb": s * jax.random.normal(ks[0], (2, embedding_dim), jnp.float32),
        "b_emb": s * jax.random.normal(ks[1], (1, embedding_dim), jnp.float32),
        # LSTM(E, H): gate order i, f, g, o; b = b_ih + b_hh
        "w_ih": s * jax.random.normal(ks[2], (embedding_dim, 4 * h_dim), jnp.float32),
        "w_hh": s * jax.random.normal(ks[3], (h_dim, 4 * h_dim), jnp.float32),
        "b_lstm": s * jax.random.normal(ks[4], (1, 4 * h_dim), jnp.float32),
        # real_classifier: Linear(H, M) + BN(M) + ReLU + Linear(M, 1) + BN(1) + ReLU
        "w1": s * jax.random.normal(ks[5], (h_dim, mlp_dim), jnp.float32),
        "b1": s * jax.random.normal(ks[6], (1, mlp_dim), jnp.float32),
        "g1": jnp.ones((1, mlp_dim), jnp.float32),    # BN weight (PyTorch default init)
        "be1": jnp.zeros((1, mlp_dim), jnp.float32),  # BN bias
        "w2": s * jax.random.normal(ks[7], (mlp_dim, 1), jnp.float32),
        "b2": s * jax.random.normal(ks[8], (1, 1), jnp.float32),
        "g2": jnp.ones((1, 1), jnp.float32),
        "be2": jnp.zeros((1, 1), jnp.float32),
    }


if __name__ == "__main__":
    obs_len, pred_len = 8, 8
    seq_len = obs_len + pred_len      # T = 16
    batch = 8                         # number of pedestrians
    embedding_dim = 32
    h_dim = 32                        # -> 4H = 128 lanes (full vreg width)
    mlp_dim = 128

    key = jax.random.PRNGKey(0)
    k_traj, k_rel, k_par = jax.random.split(key, 3)
    traj = jax.random.normal(k_traj, (seq_len, batch, 2), jnp.float32)
    traj_rel = jax.random.normal(k_rel, (seq_len, batch, 2), jnp.float32)
    params = make_params(k_par, embedding_dim, h_dim, mlp_dim)

    # One-time param folding/packing (not part of the per-call forward path).
    kparams = jax.tree_util.tree_map(jax.block_until_ready, prepare_params(params))

    fwd = jax.jit(trajectory_discriminator_forward)
    scores, final_h = jax.block_until_ready(fwd(traj, traj_rel, kparams))

    # Cross-check against a pure-JAX f32 reference of the same forward pass.
    ref_scores, ref_h = jax.block_until_ready(reference_forward(traj_rel, params))
    np.testing.assert_allclose(np.asarray(final_h), np.asarray(ref_h),
                               rtol=1e-2, atol=1e-2)
    # scores pass through two train-mode BatchNorms; bf16 recurrence operands
    # introduce a small extra error, hence the slightly looser tolerance.
    np.testing.assert_allclose(np.asarray(scores), np.asarray(ref_scores),
                               rtol=2e-2, atol=2e-2)

    assert scores.shape == (batch, 1)
    assert final_h.shape == (batch, h_dim)
    print("KERNEL_OK")
</pallas_src>

<mosaic_0001>
module attributes {stable_mosaic.version = 11 : i64} {
  func.func @_disc_kernel(%arg0: memref<16x8x2xf32, #tpu.memory_space<vmem>>, %arg1: memref<32x128xbf16, #tpu.memory_space<vmem>>, %arg2: memref<32x128xf32, #tpu.memory_space<vmem>>, %arg3: memref<16x128xf32, #tpu.memory_space<vmem>>, %arg4: memref<8x1xf32, #tpu.memory_space<vmem>>, %arg5: memref<8x32xf32, #tpu.memory_space<vmem>>, %arg6: memref<16x8x128xf32, #tpu.memory_space<vmem>>) attributes {dimension_semantics = [], scalar_prefetch = 0 : i64, scratch_operands = 1 : i64, tpu.core_type = #tpu.core_type<tc>} {
    %c0 = arith.constant 0 : index
    %c0_0 = arith.constant 0 : index
    %0 = vector.load %arg3[%c0, %c0_0] : memref<16x128xf32, #tpu.memory_space<vmem>>, vector<1x128xf32>
    %c1 = arith.constant 1 : index
    %c0_1 = arith.constant 0 : index
    %1 = vector.load %arg3[%c1, %c0_1] : memref<16x128xf32, #tpu.memory_space<vmem>>, vector<1x128xf32>
    %c2 = arith.constant 2 : index
    %c0_2 = arith.constant 0 : index
    %2 = vector.load %arg3[%c2, %c0_2] : memref<16x128xf32, #tpu.memory_space<vmem>>, vector<1x128xf32>
    %c3 = arith.constant 3 : index
    %c0_3 = arith.constant 0 : index
    %3 = vector.load %arg3[%c3, %c0_3] : memref<16x128xf32, #tpu.memory_space<vmem>>, vector<1x128xf32>
    %c4 = arith.constant 4 : index
    %c0_4 = arith.constant 0 : index
    %4 = vector.load %arg3[%c4, %c0_4] : memref<16x128xf32, #tpu.memory_space<vmem>>, vector<1x128xf32>
    %c5 = arith.constant 5 : index
    %c0_5 = arith.constant 0 : index
    %5 = vector.load %arg3[%c5, %c0_5] : memref<16x128xf32, #tpu.memory_space<vmem>>, vector<1x1xf32>
    %c6 = arith.constant 6 : index
    %c0_6 = arith.constant 0 : index
    %6 = vector.load %arg3[%c6, %c0_6] : memref<16x128xf32, #tpu.memory_space<vmem>>, vector<1x1xf32>
    %c7 = arith.constant 7 : index
    %c0_7 = arith.constant 0 : index
    %7 = vector.load %arg3[%c7, %c0_7] : memref<16x128xf32, #tpu.memory_space<vmem>>, vector<1x1xf32>
    %c8 = arith.constant 8 : index
    %c0_8 = arith.constant 0 : index
    %8 = vector.load %arg3[%c8, %c0_8] : memref<16x128xf32, #tpu.memory_space<vmem>>, vector<1x128xf32>
    %c9 = arith.constant 9 : index
    %c0_9 = arith.constant 0 : index
    %9 = vector.load %arg3[%c9, %c0_9] : memref<16x128xf32, #tpu.memory_space<vmem>>, vector<1x128xf32>
    %c0_10 = arith.constant 0 : index
    %c0_11 = arith.constant 0 : index
    %c0_12 = arith.constant 0 : index
    %10 = vector.load %arg0[%c0_10, %c0_11, %c0_12] : memref<16x8x2xf32, #tpu.memory_space<vmem>>, vector<16x8x2xf32>
    %11 = vector.extract_strided_slice %10 {offsets = [0, 0, 0], sizes = [16, 8, 1], strides = [1, 1, 1]} : vector<16x8x2xf32> to vector<16x8x1xf32>
    %12 = vector.shape_cast %8 : vector<1x128xf32> to vector<1x1x128xf32>
    %13 = vector.broadcast %11 : vector<16x8x1xf32> to vector<16x8x128xf32>
    %14 = vector.broadcast %12 : vector<1x1x128xf32> to vector<16x8x128xf32>
    %15 = arith.mulf %13, %14 : vector<16x8x128xf32>
    %16 = vector.extract_strided_slice %10 {offsets = [0, 0, 1], sizes = [16, 8, 1], strides = [1, 1, 1]} : vector<16x8x2xf32> to vector<16x8x1xf32>
    %17 = vector.shape_cast %9 : vector<1x128xf32> to vector<1x1x128xf32>
    %18 = vector.broadcast %16 : vector<16x8x1xf32> to vector<16x8x128xf32>
    %19 = vector.broadcast %17 : vector<1x1x128xf32> to vector<16x8x128xf32>
    %20 = arith.mulf %18, %19 : vector<16x8x128xf32>
    %21 = arith.addf %15, %20 : vector<16x8x128xf32>
    %22 = vector.shape_cast %0 : vector<1x128xf32> to vector<1x1x128xf32>
    %23 = vector.broadcast %22 : vector<1x1x128xf32> to vector<16x8x128xf32>
    %24 = arith.addf %21, %23 : vector<16x8x128xf32>
    %c0_13 = arith.constant 0 : index
    %c0_14 = arith.constant 0 : index
    %c0_15 = arith.constant 0 : index
    %25 = vector.load %arg6[%c0_13, %c0_14, %c0_15] : memref<16x8x128xf32, #tpu.memory_space<vmem>>, vector<16x8x128xf32>
    tpu.vector_store %arg6[%c0_13, %c0_14, %c0_15], %24 {strides = array<i32>} : memref<16x8x128xf32, #tpu.memory_space<vmem>>, vector<16x8x128xf32>,
    %c0_16 = arith.constant 0 : index
    %c0_17 = arith.constant 0 : index
    %26 = vector.load %arg1[%c0_16, %c0_17] : memref<32x128xbf16, #tpu.memory_space<vmem>>, vector<32x128xbf16>
    %27 = tpu.iota {dimensions = array<i32: 1>} : vector<8x128xi32>
    %c64_i32 = arith.constant 64 : i32
    %28 = vector.broadcast %c64_i32 : i32 to vector<8x128xi32>
    %29 = arith.cmpi sge, %27, %28 : vector<8x128xi32>
    %c96_i32 = arith.constant 96 : i32
    %30 = vector.broadcast %c96_i32 : i32 to vector<8x128xi32>
    %31 = arith.cmpi slt, %27, %30 : vector<8x128xi32>
    %32 = arith.andi %29, %31 : vector<8x128xi1>
    %cst = arith.constant 0.000000e+00 : f32
    %33 = vector.broadcast %cst : f32 to vector<8x32xf32>
    %cst_18 = arith.constant 0.000000e+00 : f32
    %34 = vector.broadcast %cst_18 : f32 to vector<8x32xf32>
    %c0_i32 = arith.constant 0 : i32
    %c4_i32 = arith.constant 4 : i32
    %35 = arith.addi %c0_i32, %c4_i32 : i32
    %c1_i32 = arith.constant 1 : i32
    %36:2 = scf.for %arg7 = %c0_i32 to %35 step %c1_i32 iter_args(%arg8 = %33, %arg9 = %34) -> (vector<8x32xf32>, vector<8x32xf32>)  : i32 {
      %c4_i32_40 = arith.constant 4 : i32
      %101 = arith.muli %arg7, %c4_i32_40 : i32
      %c0_i32_41 = arith.constant 0 : i32
      %102 = arith.addi %101, %c0_i32_41 : i32
      %103 = arith.index_cast %102 : i32 to index
      %c0_42 = arith.constant 0 : index
      %c0_43 = arith.constant 0 : index
      %104 = vector.load %arg6[%103, %c0_42, %c0_43] : memref<16x8x128xf32, #tpu.memory_space<vmem>>, vector<1x8x128xf32>
      %105 = vector.shape_cast %104 : vector<1x8x128xf32> to vector<8x128xf32>
      %106 = arith.truncf %arg8 : vector<8x32xf32> to vector<8x32xbf16>
      %cst_44 = arith.constant dense<0.000000e+00> : vector<8x128xf32>
      %107 = tpu.matmul %106, %26, %cst_44 {dimension_numbers = #tpu.dot_dimension_numbers<[1], [0], [0], [1], [0, 0, 1, 1], [], []>} : vector<8x32xbf16>, vector<32x128xbf16>, vector<8x128xf32> -> vector<8x128xf32>
      %108 = arith.addf %105, %107 : vector<8x128xf32>
      %109 = arith.negf %108 : vector<8x128xf32>
      %110 = math.exp %109 : vector<8x128xf32>
      %cst_45 = arith.constant 1.000000e+00 : f32
      %111 = vector.broadcast %cst_45 : f32 to vector<8x128xf32>
      %112 = arith.addf %111, %110 : vector<8x128xf32>
      %113 = arith.divf %111, %112 : vector<8x128xf32>
      %cst_46 = arith.constant 2.000000e+00 : f32
      %114 = vector.broadcast %cst_46 : f32 to vector<8x128xf32>
      %115 = arith.mulf %114, %113 : vector<8x128xf32>
      %cst_47 = arith.constant 1.000000e+00 : f32
      %116 = vector.broadcast %cst_47 : f32 to vector<8x128xf32>
      %117 = arith.subf %115, %116 : vector<8x128xf32>
      %118 = arith.select %32, %117, %113 : vector<8x128xi1>, vector<8x128xf32>
      %119 = vector.extract_strided_slice %118 {offsets = [0, 0], sizes = [8, 32], strides = [1, 1]} : vector<8x128xf32> to vector<8x32xf32>
      %120 = vector.extract_strided_slice %118 {offsets = [0, 32], sizes = [8, 32], strides = [1, 1]} : vector<8x128xf32> to vector<8x32xf32>
      %121 = vector.extract_strided_slice %118 {offsets = [0, 64], sizes = [8, 32], strides = [1, 1]} : vector<8x128xf32> to vector<8x32xf32>
      %122 = vector.extract_strided_slice %118 {offsets = [0, 96], sizes = [8, 32], strides = [1, 1]} : vector<8x128xf32> to vector<8x32xf32>
      %123 = arith.mulf %120, %arg9 : vector<8x32xf32>
      %124 = arith.mulf %119, %121 : vector<8x32xf32>
      %125 = arith.addf %123, %124 : vector<8x32xf32>
      %126 = math.tanh %125 : vector<8x32xf32>
      %127 = arith.mulf %122, %126 : vector<8x32xf32>
      %c1_i32_48 = arith.constant 1 : i32
      %128 = arith.addi %101, %c1_i32_48 : i32
      %129 = arith.index_cast %128 : i32 to index
      %c0_49 = arith.constant 0 : index
      %c0_50 = arith.constant 0 : index
      %130 = vector.load %arg6[%129, %c0_49, %c0_50] : memref<16x8x128xf32, #tpu.memory_space<vmem>>, vector<1x8x128xf32>
      %131 = vector.shape_cast %130 : vector<1x8x128xf32> to vector<8x128xf32>
      %132 = arith.truncf %127 : vector<8x32xf32> to vector<8x32xbf16>
      %cst_51 = arith.constant dense<0.000000e+00> : vector<8x128xf32>
      %133 = tpu.matmul %132, %26, %cst_51 {dimension_numbers = #tpu.dot_dimension_numbers<[1], [0], [0], [1], [0, 0, 1, 1], [], []>} : vector<8x32xbf16>, vector<32x128xbf16>, vector<8x128xf32> -> vector<8x128xf32>
      %134 = arith.addf %131, %133 : vector<8x128xf32>
      %135 = arith.negf %134 : vector<8x128xf32>
      %136 = math.exp %135 : vector<8x128xf32>
      %cst_52 = arith.constant 1.000000e+00 : f32
      %137 = vector.broadcast %cst_52 : f32 to vector<8x128xf32>
      %138 = arith.addf %137, %136 : vector<8x128xf32>
      %139 = arith.divf %137, %138 : vector<8x128xf32>
      %cst_53 = arith.constant 2.000000e+00 : f32
      %140 = vector.broadcast %cst_53 : f32 to vector<8x128xf32>
      %141 = arith.mulf %140, %139 : vector<8x128xf32>
      %cst_54 = arith.constant 1.000000e+00 : f32
      %142 = vector.broadcast %cst_54 : f32 to vector<8x128xf32>
      %143 = arith.subf %141, %142 : vector<8x128xf32>
      %144 = arith.select %32, %143, %139 : vector<8x128xi1>, vector<8x128xf32>
      %145 = vector.extract_strided_slice %144 {offsets = [0, 0], sizes = [8, 32], strides = [1, 1]} : vector<8x128xf32> to vector<8x32xf32>
      %146 = vector.extract_strided_slice %144 {offsets = [0, 32], sizes = [8, 32], strides = [1, 1]} : vector<8x128xf32> to vector<8x32xf32>
      %147 = vector.extract_strided_slice %144 {offsets = [0, 64], sizes = [8, 32], strides = [1, 1]} : vector<8x128xf32> to vector<8x32xf32>
      %148 = vector.extract_strided_slice %144 {offsets = [0, 96], sizes = [8, 32], strides = [1, 1]} : vector<8x128xf32> to vector<8x32xf32>
      %149 = arith.mulf %146, %125 : vector<8x32xf32>
      %150 = arith.mulf %145, %147 : vector<8x32xf32>
      %151 = arith.addf %149, %150 : vector<8x32xf32>
      %152 = math.tanh %151 : vector<8x32xf32>
      %153 = arith.mulf %148, %152 : vector<8x32xf32>
      %c2_i32 = arith.constant 2 : i32
      %154 = arith.addi %101, %c2_i32 : i32
      %155 = arith.index_cast %154 : i32 to index
      %c0_55 = arith.constant 0 : index
      %c0_56 = arith.constant 0 : index
      %156 = vector.load %arg6[%155, %c0_55, %c0_56] : memref<16x8x128xf32, #tpu.memory_space<vmem>>, vector<1x8x128xf32>
      %157 = vector.shape_cast %156 : vector<1x8x128xf32> to vector<8x128xf32>
      %158 = arith.truncf %153 : vector<8x32xf32> to vector<8x32xbf16>
      %cst_57 = arith.constant dense<0.000000e+00> : vector<8x128xf32>
      %159 = tpu.matmul %158, %26, %cst_57 {dimension_numbers = #tpu.dot_dimension_numbers<[1], [0], [0], [1], [0, 0, 1, 1], [], []>} : vector<8x32xbf16>, vector<32x128xbf16>, vector<8x128xf32> -> vector<8x128xf32>
      %160 = arith.addf %157, %159 : vector<8x128xf32>
      %161 = arith.negf %160 : vector<8x128xf32>
      %162 = math.exp %161 : vector<8x128xf32>
      %cst_58 = arith.constant 1.000000e+00 : f32
      %163 = vector.broadcast %cst_58 : f32 to vector<8x128xf32>
      %164 = arith.addf %163, %162 : vector<8x128xf32>
      %165 = arith.divf %163, %164 : vector<8x128xf32>
      %cst_59 = arith.constant 2.000000e+00 : f32
      %166 = vector.broadcast %cst_59 : f32 to vector<8x128xf32>
      %167 = arith.mulf %166, %165 : vector<8x128xf32>
      %cst_60 = arith.constant 1.000000e+00 : f32
      %168 = vector.broadcast %cst_60 : f32 to vector<8x128xf32>
      %169 = arith.subf %167, %168 : vector<8x128xf32>
      %170 = arith.select %32, %169, %165 : vector<8x128xi1>, vector<8x128xf32>
      %171 = vector.extract_strided_slice %170 {offsets = [0, 0], sizes = [8, 32], strides = [1, 1]} : vector<8x128xf32> to vector<8x32xf32>
      %172 = vector.extract_strided_slice %170 {offsets = [0, 32], sizes = [8, 32], strides = [1, 1]} : vector<8x128xf32> to vector<8x32xf32>
      %173 = vector.extract_strided_slice %170 {offsets = [0, 64], sizes = [8, 32], strides = [1, 1]} : vector<8x128xf32> to vector<8x32xf32>
      %174 = vector.extract_strided_slice %170 {offsets = [0, 96], sizes = [8, 32], strides = [1, 1]} : vector<8x128xf32> to vector<8x32xf32>
      %175 = arith.mulf %172, %151 : vector<8x32xf32>
      %176 = arith.mulf %171, %173 : vector<8x32xf32>
      %177 = arith.addf %175, %176 : vector<8x32xf32>
      %178 = math.tanh %177 : vector<8x32xf32>
      %179 = arith.mulf %174, %178 : vector<8x32xf32>
      %c3_i32 = arith.constant 3 : i32
      %180 = arith.addi %101, %c3_i32 : i32
      %181 = arith.index_cast %180 : i32 to index
      %c0_61 = arith.constant 0 : index
      %c0_62 = arith.constant 0 : index
      %182 = vector.load %arg6[%181, %c0_61, %c0_62] : memref<16x8x128xf32, #tpu.memory_space<vmem>>, vector<1x8x128xf32>
      %183 = vector.shape_cast %182 : vector<1x8x128xf32> to vector<8x128xf32>
      %184 = arith.truncf %179 : vector<8x32xf32> to vector<8x32xbf16>
      %cst_63 = arith.constant dense<0.000000e+00> : vector<8x128xf32>
      %185 = tpu.matmul %184, %26, %cst_63 {dimension_numbers = #tpu.dot_dimension_numbers<[1], [0], [0], [1], [0, 0, 1, 1], [], []>} : vector<8x32xbf16>, vector<32x128xbf16>, vector<8x128xf32> -> vector<8x128xf32>
      %186 = arith.addf %183, %185 : vector<8x128xf32>
      %187 = arith.negf %186 : vector<8x128xf32>
      %188 = math.exp %187 : vector<8x128xf32>
      %cst_64 = arith.constant 1.000000e+00 : f32
      %189 = vector.broadcast %cst_64 : f32 to vector<8x128xf32>
      %190 = arith.addf %189, %188 : vector<8x128xf32>
      %191 = arith.divf %189, %190 : vector<8x128xf32>
      %cst_65 = arith.constant 2.000000e+00 : f32
      %192 = vector.broadcast %cst_65 : f32 to vector<8x128xf32>
      %193 = arith.mulf %192, %191 : vector<8x128xf32>
      %cst_66 = arith.constant 1.000000e+00 : f32
      %194 = vector.broadcast %cst_66 : f32 to vector<8x128xf32>
      %195 = arith.subf %193, %194 : vector<8x128xf32>
      %196 = arith.select %32, %195, %191 : vector<8x128xi1>, vector<8x128xf32>
      %197 = vector.extract_strided_slice %196 {offsets = [0, 0], sizes = [8, 32], strides = [1, 1]} : vector<8x128xf32> to vector<8x32xf32>
      %198 = vector.extract_strided_slice %196 {offsets = [0, 32], sizes = [8, 32], strides = [1, 1]} : vector<8x128xf32> to vector<8x32xf32>
      %199 = vector.extract_strided_slice %196 {offsets = [0, 64], sizes = [8, 32], strides = [1, 1]} : vector<8x128xf32> to vector<8x32xf32>
      %200 = vector.extract_strided_slice %196 {offsets = [0, 96], sizes = [8, 32], strides = [1, 1]} : vector<8x128xf32> to vector<8x32xf32>
      %201 = arith.mulf %198, %177 : vector<8x32xf32>
      %202 = arith.mulf %197, %199 : vector<8x32xf32>
      %203 = arith.addf %201, %202 : vector<8x32xf32>
      %204 = math.tanh %203 : vector<8x32xf32>
      %205 = arith.mulf %200, %204 : vector<8x32xf32>
      scf.yield %205, %203 : vector<8x32xf32>, vector<8x32xf32>
    }
    %c4_i32_19 = arith.constant 4 : i32
    %c0_20 = arith.constant 0 : index
    %c0_21 = arith.constant 0 : index
    %37 = vector.load %arg5[%c0_20, %c0_21] : memref<8x32xf32, #tpu.memory_space<vmem>>, vector<8x32xf32>
    tpu.vector_store %arg5[%c0_20, %c0_21], %36#0 {strides = array<i32>} : memref<8x32xf32, #tpu.memory_space<vmem>>, vector<8x32xf32>,
    %c0_22 = arith.constant 0 : index
    %c0_23 = arith.constant 0 : index
    %38 = vector.load %arg2[%c0_22, %c0_23] : memref<32x128xf32, #tpu.memory_space<vmem>>, vector<32x128xf32>
    %cst_24 = arith.constant dense<0.000000e+00> : vector<8x128xf32>
    %39 = tpu.matmul %36#0, %38, %cst_24 {dimension_numbers = #tpu.dot_dimension_numbers<[1], [0], [0], [1], [0, 0, 1, 1], [], []>} : vector<8x32xf32>, vector<32x128xf32>, vector<8x128xf32> -> vector<8x128xf32>
    %40 = vector.broadcast %1 : vector<1x128xf32> to vector<8x128xf32>
    %41 = arith.addf %39, %40 : vector<8x128xf32>
    %cst_25 = arith.constant dense<0.000000e+00> : vector<128xf32>
    %42 = vector.multi_reduction <add>, %41, %cst_25 [0] : vector<8x128xf32> to vector<128xf32>
    %43 = vector.shape_cast %42 : vector<128xf32> to vector<1x128xf32>
    %cst_26 = arith.constant 8.000000e+00 : f32
    %44 = vector.broadcast %cst_26 : f32 to vector<1x128xf32>
    %45 = arith.divf %43, %44 : vector<1x128xf32>
    %46 = vector.broadcast %45 : vector<1x128xf32> to vector<8x128xf32>
    %47 = arith.subf %41, %46 : vector<8x128xf32>
    %48 = vector.broadcast %45 : vector<1x128xf32> to vector<8x128xf32>
    %49 = arith.subf %41, %48 : vector<8x128xf32>
    %50 = arith.mulf %47, %49 : vector<8x128xf32>
    %cst_27 = arith.constant dense<0.000000e+00> : vector<128xf32>
    %51 = vector.multi_reduction <add>, %50, %cst_27 [0] : vector<8x128xf32> to vector<128xf32>
    %52 = vector.shape_cast %51 : vector<128xf32> to vector<1x128xf32>
    %cst_28 = arith.constant 8.000000e+00 : f32
    %53 = vector.broadcast %cst_28 : f32 to vector<1x128xf32>
    %54 = arith.divf %52, %53 : vector<1x128xf32>
    %55 = vector.broadcast %45 : vector<1x128xf32> to vector<8x128xf32>
    %56 = arith.subf %41, %55 : vector<8x128xf32>
    %cst_29 = arith.constant 9.99999974E-6 : f32
    %57 = vector.broadcast %cst_29 : f32 to vector<1x128xf32>
    %58 = arith.addf %54, %57 : vector<1x128xf32>
    %59 = math.rsqrt %58 : vector<1x128xf32>
    %60 = vector.broadcast %59 : vector<1x128xf32> to vector<8x128xf32>
    %61 = arith.mulf %56, %60 : vector<8x128xf32>
    %62 = vector.broadcast %2 : vector<1x128xf32> to vector<8x128xf32>
    %63 = arith.mulf %61, %62 : vector<8x128xf32>
    %64 = vector.broadcast %3 : vector<1x128xf32> to vector<8x128xf32>
    %65 = arith.addf %63, %64 : vector<8x128xf32>
    %cst_30 = arith.constant 0.000000e+00 : f32
    %66 = vector.broadcast %cst_30 : f32 to vector<8x128xf32>
    %67 = arith.maximumf %65, %66 : vector<8x128xf32>
    %68 = vector.broadcast %4 : vector<1x128xf32> to vector<8x128xf32>
    %69 = arith.mulf %67, %68 : vector<8x128xf32>
    %cst_31 = arith.constant dense<0.000000e+00> : vector<8xf32>
    %70 = vector.multi_reduction <add>, %69, %cst_31 [1] : vector<8x128xf32> to vector<8xf32>
    %71 = vector.shape_cast %70 : vector<8xf32> to vector<8x1xf32>
    %72 = vector.broadcast %5 : vector<1x1xf32> to vector<8x1xf32>
    %73 = arith.addf %71, %72 : vector<8x1xf32>
    %cst_32 = arith.constant dense<0.000000e+00> : vector<1xf32>
    %74 = vector.multi_reduction <add>, %73, %cst_32 [0] : vector<8x1xf32> to vector<1xf32>
    %75 = vector.shape_cast %74 : vector<1xf32> to vector<1x1xf32>
    %cst_33 = arith.constant 8.000000e+00 : f32
    %76 = vector.broadcast %cst_33 : f32 to vector<1x1xf32>
    %77 = arith.divf %75, %76 : vector<1x1xf32>
    %78 = vector.broadcast %77 : vector<1x1xf32> to vector<8x1xf32>
    %79 = arith.subf %73, %78 : vector<8x1xf32>
    %80 = vector.broadcast %77 : vector<1x1xf32> to vector<8x1xf32>
    %81 = arith.subf %73, %80 : vector<8x1xf32>
    %82 = arith.mulf %79, %81 : vector<8x1xf32>
    %cst_34 = arith.constant dense<0.000000e+00> : vector<1xf32>
    %83 = vector.multi_reduction <add>, %82, %cst_34 [0] : vector<8x1xf32> to vector<1xf32>
    %84 = vector.shape_cast %83 : vector<1xf32> to vector<1x1xf32>
    %cst_35 = arith.constant 8.000000e+00 : f32
    %85 = vector.broadcast %cst_35 : f32 to vector<1x1xf32>
    %86 = arith.divf %84, %85 : vector<1x1xf32>
    %87 = vector.broadcast %77 : vector<1x1xf32> to vector<8x1xf32>
    %88 = arith.subf %73, %87 : vector<8x1xf32>
    %cst_36 = arith.constant 9.99999974E-6 : f32
    %89 = vector.broadcast %cst_36 : f32 to vector<1x1xf32>
    %90 = arith.addf %86, %89 : vector<1x1xf32>
    %91 = math.rsqrt %90 : vector<1x1xf32>
    %92 = vector.broadcast %91 : vector<1x1xf32> to vector<8x1xf32>
    %93 = arith.mulf %88, %92 : vector<8x1xf32>
    %94 = vector.broadcast %6 : vector<1x1xf32> to vector<8x1xf32>
    %95 = arith.mulf %93, %94 : vector<8x1xf32>
    %96 = vector.broadcast %7 : vector<1x1xf32> to vector<8x1xf32>
    %97 = arith.addf %95, %96 : vector<8x1xf32>
    %cst_37 = arith.constant 0.000000e+00 : f32
    %98 = vector.broadcast %cst_37 : f32 to vector<8x1xf32>
    %99 = arith.maximumf %97, %98 : vector<8x1xf32>
    %c0_38 = arith.constant 0 : index
    %c0_39 = arith.constant 0 : index
    %100 = vector.load %arg4[%c0_38, %c0_39] : memref<8x1xf32, #tpu.memory_space<vmem>>, vector<8x1xf32>
    tpu.vector_store %arg4[%c0_38, %c0_39], %99 {strides = array<i32>} : memref<8x1xf32, #tpu.memory_space<vmem>>, vector<8x1xf32>,
    return
  }
}

</mosaic_0001>

<bundles_post_ra>
// kernel: trajectory_discriminator_forward.1
= control target key start
LH: loop header
LB: loop body
LE: loop exit
PB: predicated region body
PF: predicated region fallthrough
CT: control target
= control target key end

     0   :  { %v1052_v2 = vmov 0   ;;  %s1381_s0 = inlined_call_operand.vmem [shape: f32[16,8,2], index: 0, kind: input, shape index: {}]   ;;  %s1382_s1 = inlined_call_operand.vmem [shape: bf16[32,128], index: 1, kind: input, shape index: {}]   ;;  %s1383_s2 = inlined_call_operand.vmem [shape: f32[32,128], index: 2, kind: input, shape index: {}]   ;;  %s1384_s3 = inlined_call_operand.vmem [shape: f32[16,128], index: 3, kind: input, shape index: {}]   ;;  %s1385_s4 = inlined_call_operand.vmem [shape: f32[8,1], index: 4, kind: output, shape index: {0}]   ;;  %s1386_s5 = inlined_call_operand.hbm [shape: f32[8,32], index: 5, kind: output, shape index: {1}]  }
   0x1   :  { %v33_v0 = vld [vmem:[%s1381_s0 + $0x10] sm:$0xff]  ;;  %v31_v1 = vld [vmem:[%s1381_s0] sm:$0xff]  ;;  %973 = vset.pattern.permute.xlu1 %v1052_v2  ;;  %972 = vset.pattern.permute.xlu0 %v1052_v2  ;;  %v34_v3 = vld [vmem:[%s1381_s0 + $0x18] sm:$0xff] }
   0x2   :  { %59 = vperm.xlu1 %973, %v33_v0   ;;  %49 = vperm.xlu0 %972, %v31_v1   ;;  %v32_v4 = vld [vmem:[%s1381_s0 + $0x8] sm:$0xff] }
   0x3   :  { %11 = vsyncpa [#allocation4], 0  ;;  %v36_v5 = vld [vmem:[%s1381_s0 + $0x28] sm:$0xff]  ;;  %v35_v6 = vld [vmem:[%s1381_s0 + $0x20] sm:$0xff]  ;;  %v1053_v17 = vmov 1   ;;  %v287_v18 = vlaneseq }
   0x4   :  { %v38_v7 = vld [vmem:[%s1381_s0 + $0x38] sm:$0xff]  ;;  %v37_v8 = vld [vmem:[%s1381_s0 + $0x30] sm:$0xff]  ;;  %v40_v9 = vld [vmem:[%s1381_s0 + $0x48] sm:$0xff] }
   0x5   :  { %v39_v10 = vld [vmem:[%s1381_s0 + $0x40] sm:$0xff]  ;;  %v42_v11 = vld [vmem:[%s1381_s0 + $0x58] sm:$0xff]  ;;  %v41_v12 = vld [vmem:[%s1381_s0 + $0x50] sm:$0xff]  ;;  %v288_v19 = vand.u32 127, %v287_v18 }
   0x6   :  { %64 = vperm.xlu1 %973, %v34_v3   ;;  %54 = vperm.xlu0 %972, %v32_v4   ;;  %v44_v13 = vld [vmem:[%s1381_s0 + $0x68] sm:$0xff]  ;;  %v43_v14 = vld [vmem:[%s1381_s0 + $0x60] sm:$0xff]  ;;  %v46_v15 = vld [vmem:[%s1381_s0 + $0x78] sm:$0xff] }
   0x7   :  { %v45_v16 = vld [vmem:[%s1381_s0 + $0x70] sm:$0xff]  ;;  %vm289_vm0 = vcmp.ge.s32.totalorder %v288_v19, 64  ;;  %vm290_vm1 = vcmp.lt.s32.totalorder %v288_v19, 96  ;;  %v1144_v20 = vld [vmem:[%s1384_s3 + $0x1] ss:$0 sm:$0xff] }
   0x8   :  { %v1149_v21 = vld [vmem:[%s1384_s3 + $0x2] ss:$0 sm:$0xff]  ;;  %v1154_v22 = vld [vmem:[%s1384_s3 + $0x3] ss:$0 sm:$0xff]  ;;  %v1159_v23 = vld [vmem:[%s1384_s3 + $0x4] ss:$0 sm:$0xff] }
   0x9   :  { %v1164_v24 = vld [vmem:[%s1384_s3 + $0x5] ss:$0 sm:$0xff]  ;;  %v1169_v25 = vld [vmem:[%s1384_s3 + $0x6] ss:$0 sm:$0xff]  ;;  %v1174_v26 = vld [vmem:[%s1384_s3 + $0x7] ss:$0 sm:$0xff] }
   0xa   :  { %74 = vperm.xlu1 %973, %v36_v5   ;;  %69 = vperm.xlu0 %972, %v35_v6   ;;  %v1179_v27 = vld [vmem:[%s1382_s1] sm:$0xf]  ;;  %v1184_v28 = vld [vmem:[%s1382_s1 + $0x4] sm:$0xf]  ;;  %v1189_v29 = vld [vmem:[%s1382_s1 + $0x8] sm:$0xf] }
   0xb   :  { %v1194_v30 = vld [vmem:[%s1382_s1 + $0xc] sm:$0xf]  ;;  %vm1196_vm2 = vmand %vm289_vm0, %vm290_vm1  ;;  %v1215_v48 = vld [vmem:[%s1384_s3 + $0x8] ss:$0 sm:$0xff] }
   0xc   :  { %v1220_v49 = vld [vmem:[%s1384_s3 + $0x9] ss:$0 sm:$0xff]  ;;  %v1229_v56 = vld [vmem:[%s1384_s3] ss:$0 sm:$0xff]  ;;  %s1285_s3 = smov 0  }
   0xe   :  { %84 = vperm.xlu1 %973, %v38_v7   ;;  %79 = vperm.xlu0 %972, %v37_v8  }
  0x12   :  { %94 = vperm.xlu1 %973, %v40_v9   ;;  %89 = vperm.xlu0 %972, %v39_v10  }
  0x16   :  { %104 = vperm.xlu1 %973, %v42_v11   ;;  %99 = vperm.xlu0 %972, %v41_v12  }
  0x1a   :  { %114 = vperm.xlu1 %973, %v44_v13   ;;  %109 = vperm.xlu0 %972, %v43_v14  }
  0x1e   :  { %124 = vperm.xlu1 %973, %v46_v15   ;;  %119 = vperm.xlu0 %972, %v45_v16  }
  0x22   :  { %975 = vset.pattern.permute.xlu1 %v1053_v17  ;;  %974 = vset.pattern.permute.xlu0 %v1053_v17 }
  0x23   :  { %152 = vperm.xlu1 %975, %v32_v4   ;;  %148 = vperm.xlu0 %974, %v31_v1  }
  0x27   :  { %156 = vperm.xlu1 %975, %v33_v0   ;;  %160 = vperm.xlu0 %974, %v34_v3  }
  0x2b   :  { %164 = vperm.xlu1 %975, %v35_v6   ;;  %168 = vperm.xlu0 %974, %v36_v5  }
  0x2f   :  { %172 = vperm.xlu1 %975, %v37_v8   ;;  %176 = vperm.xlu0 %974, %v38_v7  }
  0x33   :  { %180 = vperm.xlu1 %975, %v39_v10   ;;  %184 = vperm.xlu0 %974, %v40_v9  }
  0x37   :  { %188 = vperm.xlu1 %975, %v41_v12   ;;  %192 = vperm.xlu0 %974, %v42_v11  }
  0x3b   :  { %196 = vperm.xlu1 %975, %v43_v14   ;;  %200 = vperm.xlu0 %974, %v44_v13  }
  0x3f   :  { %204 = vperm.xlu1 %975, %v45_v16   ;;  %208 = vperm.xlu0 %974, %v46_v15  }
  0x81   :  { %v60_v32 = vpop.permute.xlu1 %59  ;;  %v50_v33 = vpop.permute.xlu0 %49 }
  0x82   :  { %v131_v52 = vmul.f32 %v1215_v48, %v50_v33  ;;  %v133_v59 = vmul.f32 %v1215_v48, %v60_v32 }
  0x85   :  { %v65_v34 = vpop.permute.xlu1 %64  ;;  %v55_v35 = vpop.permute.xlu0 %54 }
  0x86   :  { %v132_v53 = vmul.f32 %v1215_v48, %v55_v35  ;;  %v134_v60 = vmul.f32 %v1215_v48, %v65_v34 }
  0x89   :  { %v75_v36 = vpop.permute.xlu1 %74  ;;  %v70_v37 = vpop.permute.xlu0 %69 }
  0x8a   :  { %v136_v5 = vmul.f32 %v1215_v48, %v75_v36  ;;  %v135_v6 = vmul.f32 %v1215_v48, %v70_v37 }
  0x8d   :  { %v85_v38 = vpop.permute.xlu1 %84  ;;  %v80_v39 = vpop.permute.xlu0 %79 }
  0x8e   :  { %v138_v15 = vmul.f32 %v1215_v48, %v85_v38  ;;  %v137_v16 = vmul.f32 %v1215_v48, %v80_v39 }
  0x91   :  { %v95_v40 = vpop.permute.xlu1 %94  ;;  %v90_v41 = vpop.permute.xlu0 %89 }
  0x92   :  { %v140_v37 = vmul.f32 %v1215_v48, %v95_v40  ;;  %v139_v38 = vmul.f32 %v1215_v48, %v90_v41 }
  0x95   :  { %v1200_v42 = vpop.permute.xlu1 %104  ;;  %v1202_v43 = vpop.permute.xlu0 %99 }
  0x96   :  { %v141_v40 = vmul.f32 %v1215_v48, %v1202_v43 }
  0x99   :  { %v1204_v44 = vpop.permute.xlu1 %114  ;;  %v1206_v45 = vpop.permute.xlu0 %109 }
  0x9a   :  { %v143_v43 = vmul.f32 %v1215_v48, %v1206_v45 }
  0x9d   :  { %v1208_v46 = vpop.permute.xlu1 %124  ;;  %v1210_v47 = vpop.permute.xlu0 %119 }
  0x9e   :  { %v145_v45 = vmul.f32 %v1215_v48, %v1210_v47  ;;  %v1281_v47 = vmov 0.0  }
  0xa2   :  { %v153_v50 = vpop.permute.xlu1 %152  ;;  %v149_v51 = vpop.permute.xlu0 %148 }
  0xa3   :  { %v216_v54 = vmul.f32 %v1220_v49, %v153_v50  ;;  %v215_v55 = vmul.f32 %v1220_v49, %v149_v51 }
  0xa5   :  { %v232_v57 = vadd.f32 %v216_v54, %v132_v53  ;;  %v231_v58 = vadd.f32 %v215_v55, %v131_v52 }
  0xa6   :  { %v157_v61 = vpop.permute.xlu1 %156  ;;  %v161_v62 = vpop.permute.xlu0 %160 }
  0xa7   :  { %v252_v63 = vadd.f32 %v1229_v56, %v232_v57  ;;  %v251_v0 = vadd.f32 %v1229_v56, %v231_v58  ;;  %v217_v1 = vmul.f32 %v1220_v49, %v157_v61  ;;  %v218_v2 = vmul.f32 %v1220_v49, %v161_v62 }
  0xa8   :  { %v142_v58 = vmul.f32 %v1215_v48, %v1200_v42  ;;  %v144_v42 = vmul.f32 %v1215_v48, %v1204_v44  ;;  %v146_v44 = vmul.f32 %v1215_v48, %v1208_v46  ;;  %v1283_v48 = vmov 0.0  }
  0xa9   :  { %268 = vst [vmem:[#allocation2 + $0x8] sm:$0xff] %v252_v63  ;;  %267 = vst [vmem:[#allocation2] sm:$0xff] %v251_v0  ;;  %v233_v3 = vadd.f32 %v217_v1, %v133_v59  ;;  %v234_v4 = vadd.f32 %v218_v2, %v134_v60 }
  0xaa   :  { %v165_v7 = vpop.permute.xlu1 %164  ;;  %v169_v8 = vpop.permute.xlu0 %168 }
  0xab   :  { %v253_v9 = vadd.f32 %v1229_v56, %v233_v3  ;;  %v254_v10 = vadd.f32 %v1229_v56, %v234_v4  ;;  %v219_v11 = vmul.f32 %v1220_v49, %v165_v7  ;;  %v220_v12 = vmul.f32 %v1220_v49, %v169_v8 }
  0xad   :  { %269 = vst [vmem:[#allocation2 + $0x10] sm:$0xff] %v253_v9  ;;  %270 = vst [vmem:[#allocation2 + $0x18] sm:$0xff] %v254_v10  ;;  %v235_v13 = vadd.f32 %v219_v11, %v135_v6  ;;  %v236_v14 = vadd.f32 %v220_v12, %v136_v5 }
  0xae   :  { %v173_v17 = vpop.permute.xlu1 %172  ;;  %v177_v18 = vpop.permute.xlu0 %176 }
  0xaf   :  { %v255_v19 = vadd.f32 %v1229_v56, %v235_v13  ;;  %v256_v32 = vadd.f32 %v1229_v56, %v236_v14  ;;  %v221_v33 = vmul.f32 %v1220_v49, %v173_v17  ;;  %v222_v34 = vmul.f32 %v1220_v49, %v177_v18 }
  0xb1   :  { %271 = vst [vmem:[#allocation2 + $0x20] sm:$0xff] %v255_v19  ;;  %272 = vst [vmem:[#allocation2 + $0x28] sm:$0xff] %v256_v32  ;;  %v237_v35 = vadd.f32 %v221_v33, %v137_v16  ;;  %v238_v36 = vadd.f32 %v222_v34, %v138_v15 }
  0xb2   :  { %v181_v50 = vpop.permute.xlu1 %180  ;;  %v185_v39 = vpop.permute.xlu0 %184 }
  0xb3   :  { %v257_v51 = vadd.f32 %v1229_v56, %v237_v35  ;;  %v258_v52 = vadd.f32 %v1229_v56, %v238_v36  ;;  %v223_v53 = vmul.f32 %v1220_v49, %v181_v50  ;;  %v224_v54 = vmul.f32 %v1220_v49, %v185_v39 }
  0xb5   :  { %273 = vst [vmem:[#allocation2 + $0x30] sm:$0xff] %v257_v51  ;;  %274 = vst [vmem:[#allocation2 + $0x38] sm:$0xff] %v258_v52  ;;  %v239_v55 = vadd.f32 %v223_v53, %v139_v38  ;;  %v240_v57 = vadd.f32 %v224_v54, %v140_v37 }
  0xb6   :  { %v189_v41 = vpop.permute.xlu1 %188  ;;  %v193_v59 = vpop.permute.xlu0 %192 }
  0xb7   :  { %v259_v60 = vadd.f32 %v1229_v56, %v239_v55  ;;  %v260_v61 = vadd.f32 %v1229_v56, %v240_v57  ;;  %v225_v62 = vmul.f32 %v1220_v49, %v189_v41  ;;  %v226_v63 = vmul.f32 %v1220_v49, %v193_v59 }
  0xb9   :  { %275 = vst [vmem:[#allocation2 + $0x40] sm:$0xff] %v259_v60  ;;  %276 = vst [vmem:[#allocation2 + $0x48] sm:$0xff] %v260_v61  ;;  %v241_v0 = vadd.f32 %v225_v62, %v141_v40  ;;  %v242_v1 = vadd.f32 %v226_v63, %v142_v58 }
  0xba   :  { %v197_v2 = vpop.permute.xlu1 %196  ;;  %v201_v3 = vpop.permute.xlu0 %200 }
  0xbb   :  { %v261_v4 = vadd.f32 %v1229_v56, %v241_v0  ;;  %v262_v5 = vadd.f32 %v1229_v56, %v242_v1  ;;  %v227_v6 = vmul.f32 %v1220_v49, %v197_v2  ;;  %v228_v7 = vmul.f32 %v1220_v49, %v201_v3 }
  0xbd   :  { %277 = vst [vmem:[#allocation2 + $0x50] sm:$0xff] %v261_v4  ;;  %278 = vst [vmem:[#allocation2 + $0x58] sm:$0xff] %v262_v5  ;;  %v243_v8 = vadd.f32 %v227_v6, %v143_v43  ;;  %v244_v9 = vadd.f32 %v228_v7, %v144_v42 }
  0xbe   :  { %v205_v10 = vpop.permute.xlu1 %204  ;;  %v209_v11 = vpop.permute.xlu0 %208 }
  0xbf   :  { %v263_v12 = vadd.f32 %v1229_v56, %v243_v8  ;;  %v264_v13 = vadd.f32 %v1229_v56, %v244_v9  ;;  %v229_v14 = vmul.f32 %v1220_v49, %v205_v10  ;;  %v230_v15 = vmul.f32 %v1220_v49, %v209_v11 }
  0xc1   :  { %279 = vst [vmem:[#allocation2 + $0x60] sm:$0xff] %v263_v12  ;;  %280 = vst [vmem:[#allocation2 + $0x68] sm:$0xff] %v264_v13  ;;  %v245_v16 = vadd.f32 %v229_v14, %v145_v45  ;;  %v246_v17 = vadd.f32 %v230_v15, %v146_v44 }
  0xc3   :  { %v265_v18 = vadd.f32 %v1229_v56, %v245_v16  ;;  %v266_v46 = vadd.f32 %v1229_v56, %v246_v17 }
  0xc5   :  { %281 = vst [vmem:[#allocation2 + $0x70] sm:$0xff] %v265_v18  ;;  %282 = vst [vmem:[#allocation2 + $0x78] sm:$0xff] %v266_v46 }
  0xc6 LB: > { %v836_v49 = vcombine.low %v1179_v27, %v1184_v28  ;;  %v1054_v56 = vmov 0.0   ;;  %v304_v19 = vpack.c.bf16 %v1046_v48, %v1046_v48  ;;  %v837_v32 = vcombine.low %v1189_v29, %v1194_v30  ;;  %s1056_s25 = smov 32   ;;  %s867_s26 = sshll.u32 %s1050_s3, 5  ;;  %s1050_s3 = sphi %s1285_s3, %s297_s3   ;;  %v1046_v48 = vphi %v1283_v48, %v1389_v48   ;;  %v1042_v47 = vphi %v1281_v47, %v618_v47  }
  0xc7   : > { %888 = vmatprep.subr.bf16.mxu0 %v1054_v56  ;;  %896 = vmatprep.subr.bf16.mxu1 %v1054_v56  ;;  %vm1055_vm3 = vmmov 0   ;;  %vm320_vm4 = vcmask 261120   ;;  %s1302_s27 = scalar_lea.vmem [#allocation2], %s867_s26  ;;  %s1057_s28 = smov 64  }
  0xc8   : > { %889 = vmatpush3.bf16.msra.mxu0 %v836_v49  ;;  %892 = vmatprep.mubr.msk.bf16.mxu0 %vm1055_vm3, %v1054_v56  ;;  %s297_s3 = sadd.s32 1, %s1050_s3  }
  0xc9   : > { %890 = vmatprep.subr.bf16.mxu0 %v1054_v56  ;;  %897 = vmatpush3.bf16.msra.mxu1 %v836_v49  ;;  %p294_p0 = scmp.ge.s32.totalorder %s297_s3, 4  }
  0xca   : > { %306 = vrot.lane.b32.xlu0 %v304_v19, %s1056_s25  ;;  %898 = vmatprep.subr.bf16.mxu1 %v1054_v56  ;;  %s1058_s10 = smov (%p294_p0), 32   ;;  %v634_v27 = vld [vmem:[%s1383_s2 + $0x18] sm:$0xff] (%p294_p0)  ;;  %vm1060_vm5 = vmmov (%p294_p0), 0   ;;  %v1061_v28 = vmov (%p294_p0), 0.0  }
  0xcb   : > { %900 = vmatprep.mubr.msk.bf16.mxu1 %vm1055_vm3, %v1054_v56 }
  0xcc   : > { %891 = vmatpush3.bf16.msra.mxu0 %v837_v32  ;;  %v303_v34 = vld [vmem:[%s1302_s27] sm:$0xff]  ;;  %v843_v42 = vld [vmem:[%s1302_s27 + $0x8] sm:$0xff]  ;;  %v849_v48 = vld [vmem:[%s1302_s27 + $0x10] sm:$0xff] }
  0xcd   : > { %899 = vmatpush3.bf16.msra.mxu1 %v837_v32  ;;  %904 = vmatprep.subr.bf16.mxu0 %v1054_v56 }
  0xce   : > { %912 = vmatprep.subr.bf16.mxu1 %v1054_v56 }
 0x13c   : > { %v307_v33 = vpop.permute.xlu0 %306 }
 0x13d   : > { %893 = vmatmul.mubr.msk.bf16.vlgmr.msra.gmra.mrb[0].mxu0 %vm320_vm4, %v307_v33 }
 0x13e   : > { %905 = vmatpush3.bf16.msra.mxu0 %v836_v49  ;;  %908 = vmatprep.mubr.msk.bf16.mxu0 %vm1055_vm3, %v1054_v56 }
 0x13f   : > { %906 = vmatprep.subr.bf16.mxu0 %v1054_v56 }
 0x142   : > { %907 = vmatpush3.bf16.msra.mxu0 %v837_v32 }
 0x210   : > { %v358_v35 = vpop.f32.mrb[0].mxu0 }
 0x211   : > { %v364_v36 = vadd.f32 %v358_v35, %v303_v34  ;;  %v894_v37 = vpop.f32.mrb[1].mxu0 }
 0x212   : > { %v361_v38 = vpop.f32.mrb[2].mxu0 }
 0x213   : > { %v839_v50 = vmul.f32 -1.442695, %v364_v36  ;;  %v895_v39 = vpop.f32.mrb[3].mxu0 }
 0x215   : > { %976 = vpow2.f32 %v839_v50 }
 0x21f   : > { %v977_v51 = vpop.eup %976 }
 0x220   : > { %v368_v52 = vadd.f32 1.0, %v977_v51 }
 0x222   : > { %978 = vrcp.f32 %v368_v52 }
 0x22c   : > { %v979_v53 = vpop.eup %978 }
 0x22d   : > { %v371_v54 = vmul.f32 2.0, %v979_v53 }
 0x22f   : > { %v840_v55 = vadd.f32 -1.0, %v371_v54 }
 0x231   : > { %v373_v57 = vsel %vm1196_vm2, %v840_v55, %v979_v53 }
 0x232   : > { %376 = vrot.lane.b32.xlu0 %v373_v57, %s1057_s28  ;;  %v374_v41 = vmul.f32 %v1042_v47, %v373_v57 }
 0x2a4   : > { %v377_v58 = vpop.permute.xlu0 %376 }
 0x2a5   : > { %v379_v40 = vmul.f32 %v377_v58, %v373_v57 }
 0x2a7   : > { %381 = vrot.lane.b32.xlu1 %v379_v40, %s1056_s25 }
 0x319   : > { %v382_v59 = vpop.permute.xlu1 %381 }
 0x31a   : > { %v384_v60 = vadd.f32 %v382_v59, %v374_v41 }
 0x31c   : > { %980 = vtanh.f32 %v384_v60 }
 0x326   : > { %v981_v61 = vpop.eup %980 }
 0x327   : > { %387 = vrot.lane.b32.xlu1 %v981_v61, %s1057_s28 }
 0x399   : > { %v388_v62 = vpop.permute.xlu1 %387 }
 0x39a   : > { %v390_v63 = vmul.f32 %v388_v62, %v373_v57 }
 0x39c   : > { %v395_v0 = vpack.c.bf16 %v390_v63, %v390_v63 }
 0x39e   : > { %397 = vrot.lane.b32.xlu0 %v395_v0, %s1056_s25 }
 0x410   : > { %v398_v1 = vpop.permute.xlu0 %397 }
 0x411   : > { %901 = vmatmul.mubr.msk.bf16.vlgmr.msra.gmra.mrb[0].mxu1 %vm320_vm4, %v398_v1 }
 0x412   : > { %913 = vmatpush3.bf16.msra.mxu1 %v836_v49  ;;  %916 = vmatprep.mubr.msk.bf16.mxu1 %vm1055_vm3, %v1054_v56 }
 0x413   : > { %914 = vmatprep.subr.bf16.mxu1 %v1054_v56 }
 0x416   : > { %915 = vmatpush3.bf16.msra.mxu1 %v837_v32 }
 0x4e4   : > { %v436_v43 = vpop.f32.mrb[0].mxu1 }
 0x4e5   : > { %v442_v2 = vadd.f32 %v843_v42, %v436_v43  ;;  %v902_v3 = vpop.f32.mrb[1].mxu1 }
 0x4e6   : > { %v439_v4 = vpop.f32.mrb[2].mxu1 }
 0x4e7   : > { %v845_v5 = vmul.f32 -1.442695, %v442_v2  ;;  %v903_v6 = vpop.f32.mrb[3].mxu1 }
 0x4e9   : > { %982 = vpow2.f32 %v845_v5 }
 0x4f3   : > { %v983_v7 = vpop.eup %982 }
 0x4f4   : > { %v446_v8 = vadd.f32 1.0, %v983_v7 }
 0x4f6   : > { %984 = vrcp.f32 %v446_v8 }
 0x500   : > { %v985_v9 = vpop.eup %984 }
 0x501   : > { %v449_v44 = vmul.f32 2.0, %v985_v9 }
 0x503   : > { %v846_v45 = vadd.f32 -1.0, %v449_v44 }
 0x505   : > { %v451_v10 = vsel %vm1196_vm2, %v846_v45, %v985_v9 }
 0x506   : > { %454 = vrot.lane.b32.xlu1 %v451_v10, %s1057_s28  ;;  %v452_v13 = vmul.f32 %v451_v10, %v384_v60  ;;  %v855_v60 = vld [vmem:[%s1302_s27 + $0x18] sm:$0xff] }
 0x578   : > { %v455_v11 = vpop.permute.xlu1 %454 }
 0x579   : > { %v457_v12 = vmul.f32 %v455_v11, %v451_v10 }
 0x57b   : > { %459 = vrot.lane.b32.xlu0 %v457_v12, %s1056_s25  ;;  %v631_v12 = vld [vmem:[%s1383_s2] sm:$0xff] (%p294_p0) }
 0x5ed   : > { %v460_v14 = vpop.permute.xlu0 %459 }
 0x5ee   : > { %v462_v15 = vadd.f32 %v460_v14, %v452_v13  ;;  %v632_v13 = vld [vmem:[%s1383_s2 + $0x8] sm:$0xff] (%p294_p0)  ;;  %v633_v14 = vld [vmem:[%s1383_s2 + $0x10] sm:$0xff] (%p294_p0)  ;;  %s1062_s2 = smov (%p294_p0), [#allocation3]  }
 0x5ef   :  { %v935_v29 = vpack.c.bf16 (%p294_p0), %v634_v27, %v633_v14  ;;  %s796_s13 = sshll.u32 (%p294_p0), %s1062_s2, 4  ;;  %s797_s13 = int_to_ptr.vmem [resolvable:$true] %s796_s13 }
 0x5f0   : > { %986 = vtanh.f32 %v462_v15  ;;  %s1004_s14 = scalar_lea.vmem (%p294_p0), %s797_s13, 128  ;;  %p1009_p2 = scmp.lt.s32.totalorder (%p294_p0), %s797_s13, %s797_s13 }
 0x5f1   :  { %p1005_p1 = scmp.ne.s32.totalorder (%p294_p0), %s797_s13, %s1004_s14  ;;  %p1010_p3 = scmp.lt.s32.totalorder (%p294_p0), %s1004_s14, %s1004_s14 }
 0x5f3   :  { %p1011_p4 = por (%p294_p0), %p1010_p3, %p1009_p2 }
 0x5f5   :  { %p1012_p5 = pnand (%p294_p0), %p1011_p4, %p1005_p1 }
 0x5fa   : > { %v987_v16 = vpop.eup %986 }
 0x5fb   : > { %465 = vrot.lane.b32.xlu1 %v987_v16, %s1057_s28  ;;  %v932_v16 = vpack.c.bf16 (%p294_p0), %v632_v13, %v631_v12 }
 0x66d   : > { %v466_v17 = vpop.permute.xlu1 %465 }
 0x66e   : > { %v468_v18 = vmul.f32 %v466_v17, %v451_v10 }
 0x670   : > { %v473_v46 = vpack.c.bf16 %v468_v18, %v468_v18 }
 0x672   : > { %475 = vrot.lane.b32.xlu0 %v473_v46, %s1056_s25 }
 0x6e4   : > { %v476_v47 = vpop.permute.xlu0 %475 }
 0x6e5   : > { %909 = vmatmul.mubr.msk.bf16.vlgmr.msra.gmra.mrb[4].mxu0 %vm320_vm4, %v476_v47 }
 0x6e6   :  { %928 = vmatprep.mubr.msk.f32.mxu0 (%p294_p0), %vm1060_vm5, %v1061_v28 }
 0x7b8   : > { %v514_v49 = vpop.f32.mrb[4].mxu0 }
 0x7b9   : > { %v520_v56 = vadd.f32 %v849_v48, %v514_v49  ;;  %v910_v19 = vpop.f32.mrb[5].mxu0 }
 0x7ba   : > { %v517_v32 = vpop.f32.mrb[6].mxu0 }
 0x7bb   : > { %v851_v33 = vmul.f32 -1.442695, %v520_v56  ;;  %v911_v34 = vpop.f32.mrb[7].mxu0 }
 0x7bd   : > { %988 = vpow2.f32 %v851_v33 }
 0x7c7   : > { %v989_v35 = vpop.eup %988 }
 0x7c8   : > { %v524_v36 = vadd.f32 1.0, %v989_v35 }
 0x7ca   : > { %990 = vrcp.f32 %v524_v36 }
 0x7d4   : > { %v991_v37 = vpop.eup %990 }
 0x7d5   : > { %v527_v38 = vmul.f32 2.0, %v991_v37 }
 0x7d7   : > { %v852_v50 = vadd.f32 -1.0, %v527_v38 }
 0x7d9   : > { %v529_v39 = vsel %vm1196_vm2, %v852_v50, %v991_v37 }
 0x7da   : > { %532 = vrot.lane.b32.xlu1 %v529_v39, %s1057_s28  ;;  %v530_v53 = vmul.f32 %v529_v39, %v462_v15  ;;  %v1059_v15 = vmov (%p294_p0), 0.0|0.0  }
 0x7db   :  { %931 = vmatprep.subr.bf16.mxu0 (%p294_p0), %v1059_v15 }
 0x7dc   :  { %933 = vmatpush3.bf16.msra.mxu0 (%p294_p0), %v932_v16 }
 0x7dd   :  { %934 = vmatprep.subr.bf16.mxu0 (%p294_p0), %v1059_v15 }
 0x7e0   :  { %936 = vmatpush3.bf16.msra.mxu0 (%p294_p0), %v935_v29 }
 0x84c   : > { %v533_v51 = vpop.permute.xlu1 %532 }
 0x84d   : > { %v535_v52 = vmul.f32 %v533_v51, %v529_v39 }
 0x84f   : > { %537 = vrot.lane.b32.xlu0 %v535_v52, %s1056_s25 }
 0x8c1   : > { %v538_v54 = vpop.permute.xlu0 %537 }
 0x8c2   : > { %v540_v55 = vadd.f32 %v538_v54, %v530_v53 }
 0x8c4   : > { %992 = vtanh.f32 %v540_v55 }
 0x8ce   : > { %v993_v57 = vpop.eup %992 }
 0x8cf   : > { %543 = vrot.lane.b32.xlu1 %v993_v57, %s1057_s28 }
 0x941   : > { %v544_v58 = vpop.permute.xlu1 %543 }
 0x942   : > { %v546_v40 = vmul.f32 %v544_v58, %v529_v39 }
 0x944   : > { %v551_v41 = vpack.c.bf16 %v546_v40, %v546_v40 }
 0x946   : > { %553 = vrot.lane.b32.xlu0 %v551_v41, %s1056_s25 }
 0x9b8   : > { %v554_v59 = vpop.permute.xlu0 %553 }
 0x9b9   : > { %917 = vmatmul.mubr.msk.bf16.vlgmr.msra.gmra.mrb[4].mxu1 %vm320_vm4, %v554_v59 }
 0xa8c   : > { %v592_v61 = vpop.f32.mrb[4].mxu1 }
 0xa8d   : > { %v598_v62 = vadd.f32 %v855_v60, %v592_v61  ;;  %v918_v63 = vpop.f32.mrb[5].mxu1 }
 0xa8e   : > { %v595_v0 = vpop.f32.mrb[6].mxu1 }
 0xa8f   : > { %v857_v1 = vmul.f32 -1.442695, %v598_v62  ;;  %v919_v42 = vpop.f32.mrb[7].mxu1 }
 0xa91   : > { %994 = vpow2.f32 %v857_v1 }
 0xa9b   : > { %v995_v43 = vpop.eup %994 }
 0xa9c   : > { %v602_v2 = vadd.f32 1.0, %v995_v43 }
 0xa9e   : > { %996 = vrcp.f32 %v602_v2 }
 0xaa8   : > { %v997_v3 = vpop.eup %996 }
 0xaa9   : > { %v605_v4 = vmul.f32 2.0, %v997_v3 }
 0xaab   : > { %v858_v5 = vadd.f32 -1.0, %v605_v4 }
 0xaad   : > { %v607_v6 = vsel %vm1196_vm2, %v858_v5, %v997_v3 }
 0xaae   : > { %610 = vrot.lane.b32.xlu1 %v607_v6, %s1057_s28  ;;  %v608_v9 = vmul.f32 %v607_v6, %v540_v55 }
 0xb20   : > { %v611_v7 = vpop.permute.xlu1 %610 }
 0xb21   : > { %v613_v8 = vmul.f32 %v611_v7, %v607_v6 }
 0xb23   : > { %615 = vrot.lane.b32.xlu0 %v613_v8, %s1056_s25 }
 0xb95   : > { %v616_v44 = vpop.permute.xlu0 %615 }
 0xb96   : > { %v618_v47 = vadd.f32 %v616_v44, %v608_v9  }
 0xb98   : > { %998 = vtanh.f32 %v618_v47 }
 0xba2   : > { %v999_v45 = vpop.eup %998 }
 0xba3   : > { %621 = vrot.lane.b32.xlu1 %v999_v45, %s1057_s28 }
 0xc12   :  { %296 = sbr.rel (!%p294_p0) target bundleno = 198 (0xc6), region = 55 }
 0xc15   : > { %v622_v10 = vpop.permute.xlu1 %621 }
 0xc16   : > { %v624_v11 = vmul.f32 %v622_v10, %v607_v6  }
 0xc18   : > { %v1389_v48 = vmov %v624_v11  ;;  %626 = vrot.lane.b32.xlu0 (%p294_p0), %v624_v11, %s1058_s10 }
 0xc8a   :  { %v627_v30 = vpop.permute.xlu0 %626 }
 0xc8b   :  { %630 = vst.msk [vmem:[#allocation3] sm:$0xff] %vm320_vm4, %v627_v30  ;;  %929 = vmatmul.mubr.msk.f32.vlgmr.msra.gmra.mrb[0].mxu0 %vm320_vm4, %v627_v30 }
 0xd5e   :  { %v707_v31 = vpop.f32.mrb[0].mxu0 }
 0xd5f   :  { %v708_v17 = vadd.f32 %v1144_v20, %v707_v31  ;;  %v930_v18 = vpop.f32.mrb[1].mxu0 }
 0xd61   :  { %v711_v46 = vrot.slane %v708_v17, 4 }
 0xd63   :  { %v712_v47 = vadd.f32 %v711_v46, %v708_v17 }
 0xd65   :  { %v713_v48 = vrot.slane %v712_v47, 2 }
 0xd67   :  { %v714_v49 = vadd.f32 %v713_v48, %v712_v47 }
 0xd69   :  { %v715_v56 = vrot.slane %v714_v49, 1 }
 0xd6b   :  { %v716_v19 = vadd.f32 %v715_v56, %v714_v49 }
 0xd6d   :  { %v718_v32 = vmul.f32 0.125, %v716_v19 }
 0xd6f   :  { %v719_v33 = vsub.f32 %v708_v17, %v718_v32 }
 0xd71   :  { %v720_v34 = vmul.f32 %v719_v33, %v719_v33 }
 0xd73   :  { %v721_v35 = vrot.slane %v720_v34, 4 }
 0xd75   :  { %v722_v36 = vadd.f32 %v721_v35, %v720_v34 }
 0xd77   :  { %v723_v37 = vrot.slane %v722_v36, 2 }
 0xd79   :  { %v724_v38 = vadd.f32 %v723_v37, %v722_v36 }
 0xd7b   :  { %v725_v50 = vrot.slane %v724_v38, 1 }
 0xd7d   :  { %v726_v39 = vadd.f32 %v725_v50, %v724_v38 }
 0xd7f   :  { %v727_v51 = vmul.f32 0.125, %v726_v39 }
 0xd81   :  { %v728_v52 = vadd.f32 1e-05, %v727_v51 }
 0xd83   :  { %1000 = vrsqrt.f32 %v728_v52 }
 0xd8d   :  { %v1001_v20 = vpop.eup %1000 }
 0xd8e   :  { %v730_v53 = vmul.f32 %v1001_v20, %v719_v33 }
 0xd90   :  { %v735_v54 = vmul.f32 %v1149_v21, %v730_v53 }
 0xd92   :  { %v740_v55 = vadd.f32 %v1154_v22, %v735_v54 }
 0xd94   :  { %v741_v57 = vmax.f32 %v740_v55, 0.0 }
 0xd96   :  { %v746_v58 = vmul.f32 %v1159_v23, %v741_v57 }
 0xd98   :  { %747 = vadd.xlane.f32.xlu0 %v746_v58 }
 0xd99   :  { %1015 = shalt.err (!%p1012_p5)
}
 0xd9a   :  { %s1016_s17 = scalar_lea.hbm %s1386_s5, 128 }
 0xd9b   :  { %p1017_p6 = scmp.ne.s32.totalorder %s1386_s5, %s1016_s17  ;;  %p1020_p7 = scmp.lt.u32.totalorder %s1016_s17, %s1386_s5 }
 0xd9d   :  { %p1022_p8 = pnand %p1020_p7, %p1017_p6 }
 0xd9f   :  { %1025 = shalt.err (!%p1022_p8)
}
 0xda0   :  { %799 = dma.vmem_to_hbm [thread:$0]  %s797_s13, 128, %s1386_s5, [#allocation4]   ;;  %vm754_vm6 = vcmask 7168  }
 0xe25   :  { %v748_v21 = vpop.xlane.xlu0 %747 }
 0xe26   :  { %v753_v22 = vadd.f32 %v1164_v24, %v748_v21 }
 0xe28   :  { %v755_v23 = vsel %vm754_vm6, %v753_v22, 0.0 }
 0xe29   :  { %v756_v40 = vrot.slane %v755_v23, 4 }
 0xe2b   :  { %v757_v41 = vadd.f32 %v756_v40, %v755_v23 }
 0xe2d   :  { %v758_v59 = vrot.slane %v757_v41, 2 }
 0xe2f   :  { %v759_v60 = vadd.f32 %v758_v59, %v757_v41 }
 0xe31   :  { %v760_v61 = vrot.slane %v759_v60, 1 }
 0xe33   :  { %v761_v62 = vadd.f32 %v760_v61, %v759_v60 }
 0xe35   :  { %v762_v63 = vmul.f32 0.125, %v761_v62 }
 0xe37   :  { %v763_v0 = vsub.f32 %v753_v22, %v762_v63 }
 0xe39   :  { %v764_v1 = vmul.f32 %v763_v0, %v763_v0 }
 0xe3b   :  { %v765_v42 = vsel %vm754_vm6, %v764_v1, 0.0 }
 0xe3c   :  { %v766_v43 = vrot.slane %v765_v42, 4 }
 0xe3e   :  { %v767_v2 = vadd.f32 %v766_v43, %v765_v42 }
 0xe40   :  { %v768_v3 = vrot.slane %v767_v2, 2 }
 0xe42   :  { %v769_v4 = vadd.f32 %v768_v3, %v767_v2 }
 0xe44   :  { %v770_v5 = vrot.slane %v769_v4, 1 }
 0xe46   :  { %v771_v6 = vadd.f32 %v770_v5, %v769_v4 }
 0xe48   :  { %v772_v24 = vmul.f32 0.125, %v771_v6 }
 0xe4a   :  { %v773_v7 = vadd.f32 1e-05, %v772_v24 }
 0xe4c   :  { %1002 = vrsqrt.f32 %v773_v7 }
 0xe56   :  { %v1003_v8 = vpop.eup %1002 }
 0xe57   :  { %v775_v9 = vmul.f32 %v1003_v8, %v763_v0 }
 0xe59   :  { %v780_v44 = vmul.f32 %v1169_v25, %v775_v9 }
 0xe5b   :  { %v785_v45 = vadd.f32 %v1174_v26, %v780_v44 }
 0xe5d   :  { %v786_v10 = vmax.f32 %v785_v45, 0.0 }
 0xe5f   :  { %787 = vst.msk [vmem:[%s1385_s4] sm:$0xff] %vm754_vm6, %v786_v10 }
 0xe60   :  { %1038 = dma.done.wait [#allocation4], 128  }
 0xe61   :  { %1039 = vsyncadd [#allocation4], 4294967168 }
 0xe62   :  { %805 = vsyncpa [#allocation4], 1 }

</bundles_post_ra>
